<compile_context>
chip_gen: v6e
topology: v6e:2x2x1
jax: 0.10.0
libtpu: 0.0.40
codegen_flags: <defaults>
</compile_context>

<pallas_src>
import jax
import jax.numpy as jnp
from jax.experimental import pallas as pl
from jax.experimental.pallas import tpu as pltpu


_TARGET_BLOCK_BYTES = 4 * 1024 * 1024   # per x/out block (double-buffered in+out = 16 MiB)
_MAX_TT = 8192                          # lane-axis tile cap (multiple of 128, long DMA runs)
_MIN_GRID_BLOCKS = 4                    # >= 2 blocks per v7x TensorCore
_MIN_SPLIT_BYTES = 1 << 20              # only force multi-block grids above this size
_MIN_PALLAS_BYTES = 1 << 20             # below this, XLA fallback wins on fixed overhead
_VMEM_LIMIT_BYTES = 32 << 20            # safe on v5e/v6e/v7x; needed on v5e for 4 MiB blocks


def _cdiv(a, b):
    return (a + b - 1) // b


def _scale_kernel(x_ref, gain_ref, o_ref):
    # x_ref:    (TR, TT) tile of the flattened (B*C, T) input
    # gain_ref: (TR, 1)  per-row gain, broadcast over the lane (T) axis
    # o_ref:    (TR, TT) output tile
    o_ref[...] = (x_ref[...] * gain_ref[...]).astype(o_ref.dtype)


def _choose_tiles(rows, cols, itemsize):
    """Pick a lane-dense (TR, TT) block of roughly _TARGET_BLOCK_BYTES.

    Prefers long contiguous lane runs (fewer DMA descriptors), then fills the
    sublane axis up to the byte target.  For tensors >= _MIN_SPLIT_BYTES the
    block is shrunk until the grid has >= _MIN_GRID_BLOCKS blocks so megacore
    sharding and DMA/writeback overlap kick in.
    """
    sub = max(8, 32 // max(1, itemsize))          # sublane pack: 8 (f32), 16 (bf16)

    # Lane axis: full T when it fits, else a long multiple-of-128 run.
    tt = cols if cols <= _MAX_TT else _MAX_TT

    # Sublane axis: fill up to the byte target, multiple of the sublane pack.
    tr_cap = max(sub, _TARGET_BLOCK_BYTES // max(1, tt * itemsize))
    tr_cap = max(sub, (tr_cap // sub) * sub)
    tr = rows if rows <= tr_cap else tr_cap

    # Guarantee enough parallel blocks for v7x's 2 TensorCores + pipelining.
    if rows * cols * itemsize >= _MIN_SPLIT_BYTES:
        while _cdiv(rows, tr) * _cdiv(cols, tt) < _MIN_GRID_BLOCKS:
            if tr > sub:
                tr = max(sub, ((tr // 2) // sub) * sub)
            elif tt > 128:
                tt = max(128, ((tt // 2) // 128) * 128)
            else:
                break
    return tr, tt


def scale_forward(x, noise, scale, *, training=True, use_pallas=None, donate_x=False):
    """Pallas equivalent of Scale.forward.

    x:        (B, C, T) array
    noise:    (B, C, 1) standard-normal draws (the `torch.randn(B, C, 1)` term)
    scale:    python float (kept static; a traced scale would trigger recompiles)
    use_pallas: True/False to force; None = auto (Pallas only for tensors big
              enough to amortize kernel-launch / per-step overhead).
              T < 128 always uses the XLA fallback (lane-sparse stores).
    donate_x: set True only when the caller genuinely donates x (e.g. jit
              donate_argnums); then the output aliases the input buffer like
              torch's `x *= ...`.  Default False avoids XLA's defensive copy.
    """
    if not training or scale == 0.0:
        return x

    B, C, T = x.shape
    rows = B * C
    itemsize = jnp.dtype(x.dtype).itemsize

    # Per-(B, C) gain, computed once (O(B*C), trivial) in f32 for accuracy;
    # kept in x.dtype for 16-bit inputs so the hot-loop multiply is native.
    gain = 1.0 + noise.reshape(rows, 1).astype(jnp.float32) * float(scale)
    if itemsize <= 2:
        gain = gain.astype(x.dtype)

    small = rows * T * itemsize < _MIN_PALLAS_BYTES
    if T < 128 or use_pallas is False or (use_pallas is None and small):
        # Lane-sparse or tiny tensors: XLA's fused elementwise op is better.
        return (x.reshape(rows, T) * gain).astype(x.dtype).reshape(B, C, T)

    x2d = x.reshape(rows, T)                       # free row-major reshape
    tr, tt = _choose_tiles(rows, T, itemsize)
    grid = (_cdiv(rows, tr), _cdiv(T, tt))

    extra = {}
    if donate_x:
        extra["input_output_aliases"] = {0: 0}     # true in-place, matches `x *= ...`

    out2d = pl.pallas_call(
        _scale_kernel,
        out_shape=jax.ShapeDtypeStruct((rows, T), x.dtype),
        grid=grid,
        in_specs=[
            pl.BlockSpec((tr, tt), lambda r, c: (r, c)),   # x tile
            pl.BlockSpec((tr, 1), lambda r, c: (r, 0)),    # per-row gain (resident per row-block)
        ],
        out_specs=pl.BlockSpec((tr, tt), lambda r, c: (r, c)),
        compiler_params=pltpu.CompilerParams(
            dimension_semantics=("parallel", "parallel"),
            vmem_limit_bytes=_VMEM_LIMIT_BYTES,
        ),
        cost_estimate=pl.CostEstimate(
            flops=rows * T,
            transcendentals=0,
            bytes_accessed=2 * rows * T * itemsize + rows * jnp.dtype(gain.dtype).itemsize,
        ),
        **extra,
    )(x2d, gain)

    return out2d.reshape(B, C, T)


if __name__ == "__main__":
    scale = 0.5  # module default is 0.0 (identity); nonzero exercises the kernel
    key = jax.random.PRNGKey(0)

    def _check(B, C, T, dtype=jnp.float32, use_pallas=True, atol=1e-5, rtol=1e-5):
        kx, kn = jax.random.split(jax.random.fold_in(key, B * 100000 + C * 1000 + T))
        x = jax.random.normal(kx, (B, C, T), dtype=dtype)
        noise = jax.random.normal(kn, (B, C, 1), dtype=jnp.float32)

        # Reference in f32 (no aliasing in the default path, so x is untouched).
        ref = (x.astype(jnp.float32) * (1.0 + noise * scale)).astype(dtype)

        out = scale_forward(x, noise, scale, training=True, use_pallas=use_pallas)
        out = jax.block_until_ready(out)
        assert out.shape == x.shape and out.dtype == x.dtype
        assert jnp.allclose(out.astype(jnp.float32), ref.astype(jnp.float32),
                            atol=atol, rtol=rtol)

        # Eval-mode forward is identity, as in the PyTorch module.
        out_eval = scale_forward(x, noise, scale, training=False)
        assert jnp.array_equal(out_eval, x)

        # scale == 0 is also identity (module default).
        out_zero = scale_forward(x, noise, 0.0, training=True)
        assert jnp.array_equal(out_zero, x)

    _check(2, 4, 128)                       # small, (8, 128)-aligned; grid (1, 1)
    _check(3, 5, 200)                       # ragged (rows=15, T=200) -> full-dim blocks
    _check(4, 8, 8192)                      # 1 MiB -> multi-block grid (megacore split path)
    _check(2, 4, 256, dtype=jnp.bfloat16,   # bf16 path: gain cast to bf16 in wrapper
           atol=2e-2, rtol=2e-2)
    _check(2, 4, 64, use_pallas=None)       # T < 128 -> XLA fallback path

    print("KERNEL_OK")
</pallas_src>

<mosaic_0001>
module attributes {stable_mosaic.version = 11 : i64} {
  func.func @_scale_kernel(%arg0: i32, %arg1: i32, %arg2: memref<8x128xf32, #tpu.memory_space<vmem>>, %arg3: memref<8x1xf32, #tpu.memory_space<vmem>>, %arg4: memref<8x128xf32, #tpu.memory_space<vmem>>) attributes {dimension_semantics = [#tpu.dimension_semantics<parallel>, #tpu.dimension_semantics<parallel>], iteration_bounds = array<i64: 1, 1>, scalar_prefetch = 0 : i64, scratch_operands = 0 : i64, tpu.core_type = #tpu.core_type<tc>, window_params = [{transform_indices = @transform_0, window_bounds = array<i64: 8, 128>}, {transform_indices = @transform_1, window_bounds = array<i64: 8, 1>}, {transform_indices = @transform_2, window_bounds = array<i64: 8, 128>}]} {
    %c0 = arith.constant 0 : index
    %c0_0 = arith.constant 0 : index
    %0 = vector.load %arg2[%c0, %c0_0] : memref<8x128xf32, #tpu.memory_space<vmem>>, vector<8x128xf32>
    %c0_1 = arith.constant 0 : index
    %c0_2 = arith.constant 0 : index
    %1 = vector.load %arg3[%c0_1, %c0_2] : memref<8x1xf32, #tpu.memory_space<vmem>>, vector<8x1xf32>
    %2 = vector.broadcast %1 : vector<8x1xf32> to vector<8x128xf32>
    %3 = arith.mulf %0, %2 : vector<8x128xf32>
    %c0_3 = arith.constant 0 : index
    %c0_4 = arith.constant 0 : index
    %4 = vector.load %arg4[%c0_3, %c0_4] : memref<8x128xf32, #tpu.memory_space<vmem>>, vector<8x128xf32>
    tpu.vector_store %arg4[%c0_3, %c0_4], %3 {strides = array<i32>} : memref<8x128xf32, #tpu.memory_space<vmem>>, vector<8x128xf32>,
    return
  }
  func.func @transform_0(%arg0: i32, %arg1: i32) -> (i32, i32) {
    %c0_i32 = arith.constant 0 : i32
    return %arg0, %arg1 : i32, i32
  }
  func.func @transform_1(%arg0: i32, %arg1: i32) -> (i32, i32) {
    %c0_i32 = arith.constant 0 : i32
    %c0_i32_0 = arith.constant 0 : i32
    return %arg0, %c0_i32 : i32, i32
  }
  func.func @transform_2(%arg0: i32, %arg1: i32) -> (i32, i32) {
    %c0_i32 = arith.constant 0 : i32
    return %arg0, %arg1 : i32, i32
  }
}

</mosaic_0001>

<bundles_post_ra>
// kernel: tpu_custom_call.1
= control target key start
LH: loop header
LB: loop body
LE: loop exit
PB: predicated region body
PF: predicated region fallthrough
CT: control target
= control target key end

     0   :  { %s86_s0 = inlined_call_operand.vmem [shape: f32[8,128], index: 0, kind: input, shape index: {}]   ;;  %s87_s1 = inlined_call_operand.vmem [shape: f32[8,1], index: 1, kind: input, shape index: {}]   ;;  %s88_s2 = inlined_call_operand.hbm [shape: f32[8,128], index: 2, kind: output, shape index: {}]  }
   0x1   :  { %v13_v0 = vld [vmem:[%s87_s1] sm:$0xff] }
   0x2   :  { %7 = vsyncpa [#allocation3], 0  ;;  %v60_v1 = vmov 0   ;;  %v12_v2 = vld [vmem:[%s86_s0] sm:$0xff]  ;;  %s61_s13 = smov [#allocation2]  }
   0x3   :  { %37 = vset.pattern.permute.xlu0 %v60_v1  ;;  %s27_s14 = sshll.u32 %s61_s13, 4  ;;  %s28_s14 = int_to_ptr.vmem [resolvable:$true] %s27_s14 }
   0x4   :  { %16 = vperm.xlu0 %37, %v13_v0   ;;  %s38_s15 = scalar_lea.vmem %s28_s14, 128  ;;  %p43_p1 = scmp.lt.s32.totalorder %s28_s14, %s28_s14 }
   0x5   :  { %p39_p0 = scmp.ne.s32.totalorder %s28_s14, %s38_s15  ;;  %p44_p2 = scmp.lt.s32.totalorder %s38_s15, %s38_s15 }
   0x7   :  { %p45_p3 = por %p44_p2, %p43_p1 }
   0x9   :  { %p46_p4 = pnand %p45_p3, %p39_p0 }
  0x7f   :  { %v17_v3 = vpop.permute.xlu0 %16 }
  0x80   :  { %v19_v4 = vmul.f32 %v17_v3, %v12_v2 }
  0x82   :  { %20 = vst [vmem:[#allocation2] sm:$0xff] %v19_v4 }
  0x83   :  { %49 = shalt.err (!%p46_p4)
}
  0x84   :  { %30 = dma.vmem_to_hbm [thread:$0]  %s28_s14, 128, %s88_s2, [#allocation3]  }
  0x85   :  { %58 = dma.done.wait [#allocation3], 128  }
  0x86   :  { %59 = vsyncadd [#allocation3], 4294967168 }
  0x87   :  { %34 = vsyncpa [#allocation3], 1 }

</bundles_post_ra>
